<compile_context>
chip_gen: v5e
topology: v5e:2x2
jax: 0.10.0
libtpu: 0.0.40
codegen_flags: <defaults>
</compile_context>

<pallas_src>
import math

import jax
import jax.numpy as jnp
from jax.experimental import pallas as pl
from jax.experimental.pallas import tpu as pltpu

H1 = 256
H2 = 128
LANE = 128
BF16_SUBLANE = 16          # bf16 min sublane tile (also fine for f32 blocks)
MAX_TILE_B = 512           # single-TC chips: bigger tiles, fewer grid steps


def _round_up(x, m):
    return ((x + m - 1) // m) * m


def _num_tensorcores():
    """Best-effort detection of TensorCores per chip (v7x has 2)."""
    try:
        kind = jax.devices()[0].device_kind.lower()
        if "v7" in kind:
            return 2
    except Exception:
        pass
    return 1


def _vmem_cap_bytes():
    """VMEM request ceiling with headroom for Mosaic internal scratch."""
    try:
        cap = int(pltpu.get_tpu_info().vmem_capacity_bytes)
        if cap > 0:
            return (cap * 3) // 4
    except Exception:
        pass
    return 48 * 1024 * 1024   # safe on v7x (64 MiB physical per TC)


# ----------------------------------------------------------------------------
# Kernel
# ----------------------------------------------------------------------------
def dqn_kernel(x_ref, w1_ref, b1_ref, w2_ref, b2_ref, w3_ref, b3_ref, o_ref):
    """Fused 3-layer MLP forward on one (TILE_B, obs) batch tile.

    x arrives f32 and is cast to bf16 in-kernel; weights are bf16 MXU
    operands; accumulation + bias/ReLU epilogue stay in f32 (v5e has no bf16
    VPU); output block is a lane-dense bf16 slab.
    """
    x = x_ref[...].astype(jnp.bfloat16)                 # f32 load, VPU cast
    h1 = jnp.dot(x, w1_ref[...], preferred_element_type=jnp.float32)
    h1 = jnp.maximum(h1 + b1_ref[...], 0.0).astype(jnp.bfloat16)

    h2 = jnp.dot(h1, w2_ref[...], preferred_element_type=jnp.float32)
    h2 = jnp.maximum(h2 + b2_ref[...], 0.0).astype(jnp.bfloat16)

    out = jnp.dot(h2, w3_ref[...], preferred_element_type=jnp.float32)
    o_ref[...] = (out + b3_ref[...]).astype(o_ref.dtype)


# ----------------------------------------------------------------------------
# One-time parameter prep (hoisted out of the per-call path)
# ----------------------------------------------------------------------------
def prepare_dqn_params(params):
    """Convert f32 params to kernel operands once (bf16 weights, padded last
    layer, optional obs padding). Reuse the result across forward calls."""
    obs = params["W1"].shape[0]
    n_actions = params["W3"].shape[1]
    n_pad = _round_up(max(n_actions, 1), LANE)          # lane-dense output
    # Pad obs to a 128 multiple only when obs is large (dense, aligned DMAs /
    # MXU K push); for small obs the inflated x traffic would outweigh it.
    obs_pad = _round_up(obs, LANE) if obs > LANE else obs

    w1 = params["W1"]
    if obs_pad != obs:
        w1 = jnp.pad(w1, ((0, obs_pad - obs), (0, 0)))

    return {
        "W1": w1.astype(jnp.bfloat16),
        "b1": params["b1"].astype(jnp.float32).reshape(1, H1),
        "W2": params["W2"].astype(jnp.bfloat16),
        "b2": params["b2"].astype(jnp.float32).reshape(1, H2),
        "W3": jnp.pad(params["W3"],
                      ((0, 0), (0, n_pad - n_actions))).astype(jnp.bfloat16),
        "b3": jnp.pad(params["b3"].astype(jnp.float32).reshape(1, -1),
                      ((0, 0), (0, n_pad - n_actions))),
        "obs": obs,
        "obs_pad": obs_pad,
        "n_actions": n_actions,
        "n_pad": n_pad,
    }


# ----------------------------------------------------------------------------
# Forward
# ----------------------------------------------------------------------------
def dqn_forward(x, prepped, *, tile_b=None):
    """x: (B, obs_space) float32. prepped: output of prepare_dqn_params.

    Returns (B, n_actions) float32.
    """
    B, obs = x.shape
    assert obs == prepped["obs"], "obs_space mismatch with prepared params"
    obs_pad = prepped["obs_pad"]
    n_pad = prepped["n_pad"]
    n_actions = prepped["n_actions"]
    num_tc = _num_tensorcores()

    # --- batch tile selection -----------------------------------------------
    if tile_b is None:
        tile_b = min(MAX_TILE_B, _round_up(max(B, 1), BF16_SUBLANE))
        if num_tc >= 2 and B >= 2 * BF16_SUBLANE:
            # Guarantee >=2 grid steps so both v7x TensorCores are used.
            tile_b = min(tile_b, _round_up(pl.cdiv(B, 2), BF16_SUBLANE))
    tile_b = max(BF16_SUBLANE, _round_up(tile_b, BF16_SUBLANE))
    b_pad = _round_up(B, tile_b)
    grid = (b_pad // tile_b,)

    # --- x prep: f32 all the way into the kernel (cast happens in-kernel) ---
    x_p = x.astype(jnp.float32)
    if obs_pad != obs:
        x_p = jnp.pad(x_p, ((0, 0), (0, obs_pad - obs)))
    if b_pad != B:
        x_p = jnp.pad(x_p, ((0, b_pad - B), (0, 0)))

    w1, b1 = prepped["W1"], prepped["b1"]
    w2, b2 = prepped["W2"], prepped["b2"]
    w3, b3 = prepped["W3"], prepped["b3"]

    # --- cost estimate (advisory) -------------------------------------------
    flops = 2 * b_pad * (obs_pad * H1 + H1 * H2 + H2 * n_pad)
    bytes_accessed = (
        b_pad * obs_pad * 4                             # x (f32 read)
        + (w1.size + w2.size + w3.size) * 2             # bf16 weights
        + (b1.size + b2.size + b3.size) * 4             # f32 biases
        + b_pad * n_pad * 2                             # bf16 output slab
    )
    cost = pl.CostEstimate(flops=flops, transcendentals=0,
                           bytes_accessed=bytes_accessed)

    # --- VMEM budget ----------------------------------------------------------
    weight_bytes = (obs_pad * H1 + H1 * H2 + H2 * n_pad) * 2
    bias_bytes = (H1 + H2 + n_pad) * 4
    vmem_est = (
        2 * tile_b * obs_pad * 4          # x tiles (f32, double-buffered)
        + 2 * tile_b * n_pad * 2          # out tiles (bf16, double-buffered)
        + tile_b * (H1 + H2 + n_pad) * 4  # live f32 intermediates
        + 2 * (weight_bytes + bias_bytes)  # resident weights incl. 2nd buffer
    )
    vmem_limit = min(_vmem_cap_bytes(), max(8 * 1024 * 1024, 2 * vmem_est))

    resident = lambda i: (0, 0)   # weights/biases: same block every grid step
    out = pl.pallas_call(
        dqn_kernel,
        out_shape=jax.ShapeDtypeStruct((b_pad, n_pad), jnp.bfloat16),
        grid=grid,
        in_specs=[
            pl.BlockSpec((tile_b, obs_pad), lambda i: (i, 0)),  # x (batch-tiled)
            pl.BlockSpec((obs_pad, H1), resident),              # W1
            pl.BlockSpec((1, H1), resident),                    # b1
            pl.BlockSpec((H1, H2), resident),                   # W2
            pl.BlockSpec((1, H2), resident),                    # b2
            pl.BlockSpec((H2, n_pad), resident),                # W3 (lane-padded)
            pl.BlockSpec((1, n_pad), resident),                 # b3 (lane-padded)
        ],
        out_specs=pl.BlockSpec((tile_b, n_pad), lambda i: (i, 0)),
        compiler_params=pltpu.CompilerParams(
            dimension_semantics=("parallel",),
            vmem_limit_bytes=vmem_limit,
        ),
        cost_estimate=cost,
    )(x_p, w1, b1, w2, b2, w3, b3)

    return out[:B, :n_actions].astype(jnp.float32)


# ----------------------------------------------------------------------------
# Init + reference
# ----------------------------------------------------------------------------
def init_dqn_params(key, obs_space, n_actions):
    """PyTorch nn.Linear default init: U(-k, k), k = 1/sqrt(fan_in)."""
    dims = [(obs_space, H1), (H1, H2), (H2, n_actions)]
    params = {}
    for i, (fan_in, fan_out) in enumerate(dims, start=1):
        key, kw, kb = jax.random.split(key, 3)
        bound = 1.0 / math.sqrt(fan_in)
        params[f"W{i}"] = jax.random.uniform(
            kw, (fan_in, fan_out), jnp.float32, minval=-bound, maxval=bound)
        params[f"b{i}"] = jax.random.uniform(
            kb, (1, fan_out), jnp.float32, minval=-bound, maxval=bound)
    return params


def dqn_reference(x, params):
    """Pure-JAX f32 reference for correctness check."""
    h1 = jnp.maximum(x @ params["W1"] + params["b1"], 0.0)
    h2 = jnp.maximum(h1 @ params["W2"] + params["b2"], 0.0)
    return h2 @ params["W3"] + params["b3"]


if __name__ == "__main__":
    B = 8
    obs_space = 32
    n_actions = 4

    key = jax.random.PRNGKey(0)
    key, kx = jax.random.split(key)
    x = jax.random.normal(kx, (B, obs_space), dtype=jnp.float32)
    params = init_dqn_params(key, obs_space, n_actions)

    # One-time parameter prep (hoisted out of the per-call path).
    prepped = prepare_dqn_params(params)

    out = dqn_forward(x, prepped)
    out = jax.block_until_ready(out)

    ref = dqn_reference(x, params)
    assert out.shape == (B, n_actions), f"bad shape {out.shape}"
    # bf16 MXU operands + bf16 output slab (f32 accumulation) -> loosened
    # tolerance vs the f32 reference.
    assert jnp.allclose(out, ref, atol=3e-2, rtol=3e-2), "mismatch vs reference"

    print("KERNEL_OK")
</pallas_src>

<mosaic_0001>
module attributes {stable_mosaic.version = 11 : i64} {
  func.func @dqn_kernel(%arg0: i32, %arg1: memref<16x32xf32, #tpu.memory_space<vmem>>, %arg2: memref<32x256xbf16, #tpu.memory_space<vmem>>, %arg3: memref<1x256xf32, #tpu.memory_space<vmem>>, %arg4: memref<256x128xbf16, #tpu.memory_space<vmem>>, %arg5: memref<1x128xf32, #tpu.memory_space<vmem>>, %arg6: memref<128x128xbf16, #tpu.memory_space<vmem>>, %arg7: memref<1x128xf32, #tpu.memory_space<vmem>>, %arg8: memref<16x128xbf16, #tpu.memory_space<vmem>>) attributes {dimension_semantics = [#tpu.dimension_semantics<parallel>], iteration_bounds = array<i64: 1>, scalar_prefetch = 0 : i64, scratch_operands = 0 : i64, tpu.core_type = #tpu.core_type<tc>, window_params = [{transform_indices = @transform_0, window_bounds = array<i64: 16, 32>}, {pipeline_mode = #tpu.pipeline_mode<synchronous>, transform_indices = @transform_1, window_bounds = array<i64: 32, 256>}, {pipeline_mode = #tpu.pipeline_mode<synchronous>, transform_indices = @transform_2, window_bounds = array<i64: 1, 256>}, {pipeline_mode = #tpu.pipeline_mode<synchronous>, transform_indices = @transform_3, window_bounds = array<i64: 256, 128>}, {pipeline_mode = #tpu.pipeline_mode<synchronous>, transform_indices = @transform_4, window_bounds = array<i64: 1, 128>}, {pipeline_mode = #tpu.pipeline_mode<synchronous>, transform_indices = @transform_5, window_bounds = array<i64: 128, 128>}, {pipeline_mode = #tpu.pipeline_mode<synchronous>, transform_indices = @transform_6, window_bounds = array<i64: 1, 128>}, {transform_indices = @transform_7, window_bounds = array<i64: 16, 128>}]} {
    %c0 = arith.constant 0 : index
    %c0_0 = arith.constant 0 : index
    %0 = vector.load %arg1[%c0, %c0_0] : memref<16x32xf32, #tpu.memory_space<vmem>>, vector<16x32xf32>
    %1 = arith.truncf %0 : vector<16x32xf32> to vector<16x32xbf16>
    %c0_1 = arith.constant 0 : index
    %c0_2 = arith.constant 0 : index
    %2 = vector.load %arg2[%c0_1, %c0_2] : memref<32x256xbf16, #tpu.memory_space<vmem>>, vector<32x256xbf16>
    %cst = arith.constant dense<0.000000e+00> : vector<16x256xf32>
    %3 = tpu.matmul %1, %2, %cst {dimension_numbers = #tpu.dot_dimension_numbers<[1], [0], [0], [1], [0, 0, 1, 1], [], []>} : vector<16x32xbf16>, vector<32x256xbf16>, vector<16x256xf32> -> vector<16x256xf32>
    %c0_3 = arith.constant 0 : index
    %c0_4 = arith.constant 0 : index
    %4 = vector.load %arg3[%c0_3, %c0_4] : memref<1x256xf32, #tpu.memory_space<vmem>>, vector<1x256xf32>
    %5 = vector.broadcast %4 : vector<1x256xf32> to vector<16x256xf32>
    %6 = arith.addf %3, %5 : vector<16x256xf32>
    %cst_5 = arith.constant 0.000000e+00 : f32
    %7 = vector.broadcast %cst_5 : f32 to vector<16x256xf32>
    %8 = arith.maximumf %6, %7 : vector<16x256xf32>
    %9 = arith.truncf %8 : vector<16x256xf32> to vector<16x256xbf16>
    %c0_6 = arith.constant 0 : index
    %c0_7 = arith.constant 0 : index
    %10 = vector.load %arg4[%c0_6, %c0_7] : memref<256x128xbf16, #tpu.memory_space<vmem>>, vector<256x128xbf16>
    %cst_8 = arith.constant dense<0.000000e+00> : vector<16x128xf32>
    %11 = tpu.matmul %9, %10, %cst_8 {dimension_numbers = #tpu.dot_dimension_numbers<[1], [0], [0], [1], [0, 0, 1, 1], [], []>} : vector<16x256xbf16>, vector<256x128xbf16>, vector<16x128xf32> -> vector<16x128xf32>
    %c0_9 = arith.constant 0 : index
    %c0_10 = arith.constant 0 : index
    %12 = vector.load %arg5[%c0_9, %c0_10] : memref<1x128xf32, #tpu.memory_space<vmem>>, vector<1x128xf32>
    %13 = vector.broadcast %12 : vector<1x128xf32> to vector<16x128xf32>
    %14 = arith.addf %11, %13 : vector<16x128xf32>
    %cst_11 = arith.constant 0.000000e+00 : f32
    %15 = vector.broadcast %cst_11 : f32 to vector<16x128xf32>
    %16 = arith.maximumf %14, %15 : vector<16x128xf32>
    %17 = arith.truncf %16 : vector<16x128xf32> to vector<16x128xbf16>
    %c0_12 = arith.constant 0 : index
    %c0_13 = arith.constant 0 : index
    %18 = vector.load %arg6[%c0_12, %c0_13] : memref<128x128xbf16, #tpu.memory_space<vmem>>, vector<128x128xbf16>
    %cst_14 = arith.constant dense<0.000000e+00> : vector<16x128xf32>
    %19 = tpu.matmul %17, %18, %cst_14 {dimension_numbers = #tpu.dot_dimension_numbers<[1], [0], [0], [1], [0, 0, 1, 1], [], []>} : vector<16x128xbf16>, vector<128x128xbf16>, vector<16x128xf32> -> vector<16x128xf32>
    %c0_15 = arith.constant 0 : index
    %c0_16 = arith.constant 0 : index
    %20 = vector.load %arg7[%c0_15, %c0_16] : memref<1x128xf32, #tpu.memory_space<vmem>>, vector<1x128xf32>
    %21 = vector.broadcast %20 : vector<1x128xf32> to vector<16x128xf32>
    %22 = arith.addf %19, %21 : vector<16x128xf32>
    %23 = arith.truncf %22 : vector<16x128xf32> to vector<16x128xbf16>
    %c0_17 = arith.constant 0 : index
    %c0_18 = arith.constant 0 : index
    %24 = vector.load %arg8[%c0_17, %c0_18] : memref<16x128xbf16, #tpu.memory_space<vmem>>, vector<16x128xbf16>
    tpu.vector_store %arg8[%c0_17, %c0_18], %23 {strides = array<i32>} : memref<16x128xbf16, #tpu.memory_space<vmem>>, vector<16x128xbf16>,
    return
  }
  func.func @transform_0(%arg0: i32) -> (i32, i32) {
    %c0_i32 = arith.constant 0 : i32
    %c0_i32_0 = arith.constant 0 : i32
    return %arg0, %c0_i32 : i32, i32
  }
  func.func @transform_1(%arg0: i32) -> (i32, i32) {
    %c0_i32 = arith.constant 0 : i32
    %c0_i32_0 = arith.constant 0 : i32
    %c0_i32_1 = arith.constant 0 : i32
    return %c0_i32, %c0_i32_0 : i32, i32
  }
  func.func @transform_2(%arg0: i32) -> (i32, i32) {
    %c0_i32 = arith.constant 0 : i32
    %c0_i32_0 = arith.constant 0 : i32
    %c0_i32_1 = arith.constant 0 : i32
    return %c0_i32, %c0_i32_0 : i32, i32
  }
  func.func @transform_3(%arg0: i32) -> (i32, i32) {
    %c0_i32 = arith.constant 0 : i32
    %c0_i32_0 = arith.constant 0 : i32
    %c0_i32_1 = arith.constant 0 : i32
    return %c0_i32, %c0_i32_0 : i32, i32
  }
  func.func @transform_4(%arg0: i32) -> (i32, i32) {
    %c0_i32 = arith.constant 0 : i32
    %c0_i32_0 = arith.constant 0 : i32
    %c0_i32_1 = arith.constant 0 : i32
    return %c0_i32, %c0_i32_0 : i32, i32
  }
  func.func @transform_5(%arg0: i32) -> (i32, i32) {
    %c0_i32 = arith.constant 0 : i32
    %c0_i32_0 = arith.constant 0 : i32
    %c0_i32_1 = arith.constant 0 : i32
    return %c0_i32, %c0_i32_0 : i32, i32
  }
  func.func @transform_6(%arg0: i32) -> (i32, i32) {
    %c0_i32 = arith.constant 0 : i32
    %c0_i32_0 = arith.constant 0 : i32
    %c0_i32_1 = arith.constant 0 : i32
    return %c0_i32, %c0_i32_0 : i32, i32
  }
  func.func @transform_7(%arg0: i32) -> (i32, i32) {
    %c0_i32 = arith.constant 0 : i32
    %c0_i32_0 = arith.constant 0 : i32
    return %arg0, %c0_i32 : i32, i32
  }
}

</mosaic_0001>

<bundles_post_ra>
// kernel: tpu_custom_call.1
= control target key start
LH: loop header
LB: loop body
LE: loop exit
PB: predicated region body
PF: predicated region fallthrough
CT: control target
= control target key end

     0   :  { %12 = vsyncpa [#allocation3], 0  ;;  %s839_s0 = inlined_call_operand.hbm [shape: f32[16,32], index: 0, kind: input, shape index: {}]   ;;  %s840_s1 = inlined_call_operand.hbm [shape: bf16[32,256], index: 1, kind: input, shape index: {}]   ;;  %s841_s2 = inlined_call_operand.hbm [shape: f32[1,256], index: 2, kind: input, shape index: {}]   ;;  %s842_s3 = inlined_call_operand.hbm [shape: bf16[256,128], index: 3, kind: input, shape index: {}]   ;;  %s843_s4 = inlined_call_operand.vmem [shape: f32[1,128], index: 4, kind: input, shape index: {}]   ;;  %s844_s5 = inlined_call_operand.hbm [shape: bf16[128,128], index: 5, kind: input, shape index: {}]   ;;  %s845_s6 = inlined_call_operand.vmem [shape: f32[1,128], index: 6, kind: input, shape index: {}]   ;;  %s846_s7 = inlined_call_operand.hbm [shape: bf16[16,128], index: 7, kind: output, shape index: {}]  }
   0x1   :  { %13 = vsyncpa [#allocation6], 0 }
   0x2   :  { %14 = vsyncpa [#allocation9], 0 }
   0x3   :  { %15 = vsyncpa [#allocation4], 0  ;;  %s33_s26 = sshll.u32 %s840_s1, 4  ;;  %s756_s27 = smov [#allocation5]   ;;  %s34_s26 = int_to_ptr.hbm [resolvable:$true] %s33_s26 }
   0x4   :  { %s35_s28 = sshll.u32 %s756_s27, 4  ;;  %s57_s8 = sshll.u32 %s842_s3, 4  ;;  %s36_s28 = int_to_ptr.vmem [resolvable:$true] %s35_s28  ;;  %s58_s8 = int_to_ptr.hbm [resolvable:$true] %s57_s8 }
   0x5   :  { %s757_s9 = smov 128   ;;  %s758_s10 = smov 8  }
   0x6   :  { %41 = dma.hbm_to_vmem [thread:$0]  %s34_s26, 512, %s36_s28, [#allocation6], %s757_s9, %s757_s9, %s758_s10  }
   0x7   :  { %s759_s11 = smov [#allocation8]   ;;  %s760_s13 = smov 64  }
   0x8   :  { %s59_s12 = sshll.u32 %s759_s11, 4  ;;  %s761_s14 = smov 4   ;;  %s60_s12 = int_to_ptr.vmem [resolvable:$true] %s59_s12 }
   0x9   :  { %65 = dma.hbm_to_vmem [thread:$0]  %s58_s8, 2048, %s60_s12, [#allocation9], %s760_s13, %s760_s13, %s761_s14  }
   0xa   :  { %s20_s16 = sshll.u32 %s839_s0, 4  ;;  %s762_s17 = smov [#allocation2]   ;;  %s21_s16 = int_to_ptr.hbm [resolvable:$true] %s20_s16 }
   0xb   :  { %s22_s3 = sshll.u32 %s762_s17, 4  ;;  %s47_s20 = sshll.u32 %s841_s2, 4  ;;  %s23_s3 = int_to_ptr.vmem [resolvable:$true] %s22_s3  ;;  %s48_s20 = int_to_ptr.hbm [resolvable:$true] %s47_s20 }
   0xc   :  { %28 = dma.hbm_to_vmem [thread:$0]  %s21_s16, 256, %s23_s3, [#allocation3], %s757_s9, %s757_s9, %s758_s10  }
   0xd   :  { %s763_s21 = smov [#allocation7]   ;;  %s72_s25 = sshll.u32 %s844_s5, 4  ;;  %s73_s25 = int_to_ptr.hbm [resolvable:$true] %s72_s25 }
   0xe   :  { %s49_s22 = sshll.u32 %s763_s21, 4  ;;  %s764_s0 = smov [#allocation10]   ;;  %s50_s22 = int_to_ptr.vmem [resolvable:$true] %s49_s22 }
   0xf   :  { %52 = dma.hbm_to_vmem [thread:$0]  %s48_s20, 32, %s50_s22, [#allocation6]  }
  0x10   :  { %s74_s26 = sshll.u32 %s764_s0, 4  ;;  %s75_s26 = int_to_ptr.vmem [resolvable:$true] %s74_s26 }
  0x11   :  { %80 = dma.hbm_to_vmem [thread:$0]  %s73_s25, 1024, %s75_s26, [#allocation9], %s760_s13, %s760_s13, %s761_s14  }
  0x12   :  { %748 = dma.done.wait [#allocation3], 256  }
  0x13   :  { %749 = vsyncadd [#allocation3], 4294967040 }
  0x14   :  { %750 = dma.done.wait [#allocation6], 544  }
  0x15   :  { %751 = vsyncadd [#allocation6], 4294966752 }
  0x16   :  { %752 = dma.done.wait [#allocation9], 3072  }
  0x17   :  { %753 = vsyncadd [#allocation9], 4294964224  ;;  %v455_v0 = vld [vmem:[#allocation5 + $0x10] sm:$0xf]  ;;  %v562_v1 = vld [vmem:[#allocation5 + $0x14] sm:$0xf0] }
  0x18   :  { %v447_v2 = vld [vmem:[#allocation5] sm:$0xf]  ;;  %v456_v3 = vor.u32 %v562_v1, %v455_v0  ;;  %v560_v4 = vld [vmem:[#allocation5 + $0x4] sm:$0xf0]  ;;  %v561_v5 = vld [vmem:[#allocation5 + $0x14] sm:$0xf] }
  0x19   :  { %v457_v6 = vld [vmem:[#allocation5 + $0x18] sm:$0xf0]  ;;  %v448_v7 = vor.u32 %v560_v4, %v447_v2  ;;  %v104_v8 = vld [vmem:[#allocation2] sm:$0xff]  ;;  %v559_v12 = vld [vmem:[#allocation5 + $0x4] sm:$0xf]  ;;  %vm137_vm0 = vcmask 261120  }
  0x1a   :  { %147 = vmatpush.bf16.msra.mxu1 %v456_v3  ;;  %v105_v9 = vld [vmem:[#allocation2 + $0x8] sm:$0xff]  ;;  %v460_v11 = vor.u32 %v561_v5, %v457_v6  ;;  %v449_v13 = vld [vmem:[#allocation5 + $0x8] sm:$0xf0]  ;;  %v567_v18 = vld [vmem:[#allocation8 + $0x20] sm:$0xff]  ;;  %s765_s29 = smov [#allocation11]   ;;  %s430_s9 = sshll.u32 %s846_s7, 4  ;;  %s431_s9 = int_to_ptr.hbm [resolvable:$true] %s430_s9 }
  0x1b   :  { %v570_v10 = vld [vmem:[#allocation8 + $0x38] sm:$0xff]  ;;  %v569_v14 = vld [vmem:[#allocation8 + $0x30] sm:$0xff]  ;;  %v106_v15 = vpack.c.bf16 %v105_v9, %v104_v8  ;;  %v452_v16 = vor.u32 %v559_v12, %v449_v13  ;;  %v568_v17 = vld [vmem:[#allocation8 + $0x28] sm:$0xff]  ;;  %s428_s30 = sshll.u32 %s765_s29, 4  ;;  %s429_s30 = int_to_ptr.vmem [resolvable:$true] %s428_s30 }
  0x1c   :  { %307 = vmatpush.bf16.msra.mxu2 %v570_v10  ;;  %v566_v19 = vld [vmem:[#allocation8 + $0x18] sm:$0xff]  ;;  %v565_v21 = vld [vmem:[#allocation8 + $0x10] sm:$0xff]  ;;  %v564_v23 = vld [vmem:[#allocation8 + $0x8] sm:$0xff] }
  0x1d   :  { %v578_v20 = vld [vmem:[#allocation8 + $0x78] sm:$0xff]  ;;  %v577_v22 = vld [vmem:[#allocation8 + $0x70] sm:$0xff]  ;;  %v576_v24 = vld [vmem:[#allocation8 + $0x68] sm:$0xff] }
  0x1e   :  { %148 = vmatpush.bf16.msra.mxu1 %v448_v7  ;;  %321 = vmatpush.bf16.msra.mxu3 %v578_v20  ;;  %v563_v25 = vld [vmem:[#allocation8] sm:$0xff]  ;;  %v574_v27 = vld [vmem:[#allocation8 + $0x58] sm:$0xff]  ;;  %v573_v28 = vld [vmem:[#allocation8 + $0x50] sm:$0xff] }
  0x1f   :  { %v575_v26 = vld [vmem:[#allocation8 + $0x60] sm:$0xff]  ;;  %v572_v29 = vld [vmem:[#allocation8 + $0x48] sm:$0xff]  ;;  %v111_v31 = vld [vmem:[#allocation7] sm:$0x3] }
  0x20   :  { %308 = vmatpush.bf16.msra.mxu2 %v569_v14  ;;  %v571_v30 = vld [vmem:[#allocation8 + $0x40] sm:$0xff]  ;;  %v113_v33 = vperm.slane %v111_v31, 0  ;;  %v114_v41 = vperm.slane %v111_v31, 1  ;;  %v586_v48 = vld [vmem:[#allocation10 + $0x38] sm:$0xff]  ;;  %v585_v49 = vld [vmem:[#allocation10 + $0x30] sm:$0xff] }
  0x21   :  { %461 = vmatmul.msk.bf16.vlgmr.msra.gmra.mxu1 %vm137_vm0, %v106_v15  ;;  %406 = vmatpush.bf16.msra.mxu0 %v586_v48  ;;  %v584_v50 = vld [vmem:[#allocation10 + $0x28] sm:$0xff]  ;;  %v583_v51 = vld [vmem:[#allocation10 + $0x20] sm:$0xff]  ;;  %v582_v52 = vld [vmem:[#allocation10 + $0x18] sm:$0xff] }
  0x22   :  { %161 = vmatpush.bf16.msrb.mxu1 %v460_v11  ;;  %322 = vmatpush.bf16.msra.mxu3 %v577_v22  ;;  %v581_v53 = vld [vmem:[#allocation10 + $0x10] sm:$0xff]  ;;  %v580_v54 = vld [vmem:[#allocation10 + $0x8] sm:$0xff]  ;;  %v579_v55 = vld [vmem:[#allocation10] sm:$0xff] }
  0x23   :  { %v602_v58 = vld [vmem:[%s843_s4] ss:$0 sm:$0xff] }
  0x24   :  { %309 = vmatpush.bf16.msra.mxu2 %v568_v17  ;;  %v603_v5 = vld [vmem:[%s845_s6] ss:$0 sm:$0xff] }
  0x25   :  { %407 = vmatpush.bf16.msra.mxu0 %v585_v49 }
  0x26   :  { %162 = vmatpush.bf16.msrb.mxu1 %v452_v16  ;;  %323 = vmatpush.bf16.msra.mxu3 %v576_v24 }
  0x28   :  { %310 = vmatpush.bf16.msra.mxu2 %v567_v18 }
  0x29   :  { %408 = vmatpush.bf16.msra.mxu0 %v584_v50 }
  0x2a   :  { %324 = vmatpush.bf16.msra.mxu3 %v575_v26 }
  0x2c   :  { %311 = vmatpush.bf16.msra.mxu2 %v566_v19 }
  0x2d   :  { %409 = vmatpush.bf16.msra.mxu0 %v583_v51 }
  0x2e   :  { %325 = vmatpush.bf16.msra.mxu3 %v574_v27 }
  0x30   :  { %312 = vmatpush.bf16.msra.mxu2 %v565_v21 }
  0x31   :  { %462 = vmatmul.msk.bf16.vlgmr.msrb.gmra.mxu1 %vm137_vm0, %v106_v15  ;;  %410 = vmatpush.bf16.msra.mxu0 %v582_v52 }
  0x32   :  { %326 = vmatpush.bf16.msra.mxu3 %v573_v28 }
  0x34   :  { %313 = vmatpush.bf16.msra.mxu2 %v564_v23 }
  0x35   :  { %411 = vmatpush.bf16.msra.mxu0 %v581_v53 }
  0x36   :  { %327 = vmatpush.bf16.msra.mxu3 %v572_v29 }
  0x38   :  { %314 = vmatpush.bf16.msra.mxu2 %v563_v25 }
  0x39   :  { %412 = vmatpush.bf16.msra.mxu0 %v580_v54 }
  0x3a   :  { %328 = vmatpush.bf16.msra.mxu3 %v571_v30 }
  0x3d   :  { %413 = vmatpush.bf16.msra.mxu0 %v579_v55 }
  0x9e   :  { %v150_v32 = vpop.f32.mrf.mxu1 }
  0x9f   :  { %v151_v34 = vadd.f32 %v150_v32, %v113_v33 }
  0xa1   :  { %v169_v37 = vmax.f32 %v151_v34, 0.0 }
  0xa6   :  { %v152_v35 = vpop.f32.mrf.mxu1 }
  0xa7   :  { %v153_v36 = vadd.f32 %v152_v35, %v113_v33 }
  0xa9   :  { %v171_v38 = vmax.f32 %v153_v36, 0.0 }
  0xab   :  { %v173_v39 = vpack.c.bf16 %v171_v38, %v169_v37 }
  0xad   :  { %315 = vmatmul.bf16.vlgmr.msra.gmra.mxu2 %v173_v39 }
  0xae   :  { %v164_v40 = vpop.f32.mrf.mxu1 }
  0xaf   :  { %v165_v42 = vadd.f32 %v164_v40, %v114_v41 }
  0xb1   :  { %v170_v45 = vmax.f32 %v165_v42, 0.0 }
  0xb6   :  { %v166_v43 = vpop.f32.mrf.mxu1 }
  0xb7   :  { %v167_v44 = vadd.f32 %v166_v43, %v114_v41 }
  0xb9   :  { %v172_v46 = vmax.f32 %v167_v44, 0.0 }
  0xbb   :  { %v174_v47 = vpack.c.bf16 %v172_v46, %v170_v45 }
  0xbd   :  { %329 = vmatmul.bf16.vlgmr.msra.gmra.mxu3 %v174_v47 }
 0x130   :  { %v316_v56 = vpop.f32.mrf.mxu2 }
 0x131   :  { %v317_v60 = vadd.f32 %v602_v58, %v316_v56 }
 0x138   :  { %v318_v59 = vpop.f32.mrf.mxu2 }
 0x139   :  { %v319_v61 = vadd.f32 %v602_v58, %v318_v59 }
 0x140   :  { %v330_v57 = vpop.f32.mrf.mxu3 }
 0x141   :  { %v331_v62 = vadd.f32 %v330_v57, %v317_v60 }
 0x143   :  { %v335_v1 = vmax.f32 %v331_v62, 0.0 }
 0x148   :  { %v332_v63 = vpop.f32.mrf.mxu3 }
 0x149   :  { %v333_v0 = vadd.f32 %v332_v63, %v319_v61 }
 0x14b   :  { %v336_v2 = vmax.f32 %v333_v0, 0.0 }
 0x14d   :  { %v337_v3 = vpack.c.bf16 %v336_v2, %v335_v1 }
 0x14f   :  { %414 = vmatmul.bf16.vlgmr.msra.gmra.mxu0 %v337_v3 }
 0x1cc   :  { %v415_v4 = vpop.f32.mrf.mxu0 }
 0x1cd   :  { %v416_v7 = vadd.f32 %v603_v5, %v415_v4 }
 0x1d4   :  { %v417_v6 = vpop.f32.mrf.mxu0 }
 0x1d5   :  { %v418_v8 = vadd.f32 %v603_v5, %v417_v6 }
 0x1d7   :  { %v590_v9 = vpack.c.bf16 %v418_v8, %v416_v7 }
 0x1d9   :  { %591 = vst [vmem:[#allocation11] sm:$0xff] %v590_v9  }
 0x1da   :  { %436 = dma.vmem_to_hbm [thread:$0]  %s429_s30, 128, %s431_s9, [#allocation4], %s760_s13, %s760_s13, %s761_s14  }
 0x1db   :  { %754 = dma.done.wait [#allocation4], 128  }
 0x1dc   :  { %755 = vsyncadd [#allocation4], 4294967168 }
 0x1dd   :  { %441 = vsyncpa [#allocation3], 1 }
 0x1de   :  { %442 = vsyncpa [#allocation6], 1 }
 0x1df   :  { %443 = vsyncpa [#allocation9], 1 }
 0x1e0   :  { %444 = vsyncpa [#allocation4], 1 }

</bundles_post_ra>
